<compile_context>
chip_gen: v6e
topology: v6e:2x2x1
jax: 0.10.0
libtpu: 0.0.40
codegen_flags: <defaults>
</compile_context>

<pallas_src>
import functools

import jax
import jax.numpy as jnp
from jax.experimental import pallas as pl
from jax.experimental.pallas import tpu as pltpu


def _round_up(x: int, m: int) -> int:
    return ((x + m - 1) // m) * m


def _mlp_layer_kernel(x_ref, w_ref, b_ref, o_ref, act_ref, *,
                      num_layers: int, compute_dtype):
    """One (batch-tile, layer) grid step of the MLP.

    x_ref  : (tm, P)    bf16 input tile (only consumed at l == 0)
    w_ref  : (1, P, P)  bf16 weight for layer l (streamed / double-buffered by Pallas)
    b_ref  : (1, 1, P)  f32 bias for layer l
    o_ref  : (tm, P)    output tile (written only at l == last)
    act_ref: (tm, P)    f32 VMEM scratch carrying the activation across layers
    """
    l = pl.program_id(1)

    @pl.when(l == 0)
    def _():
        act_ref[...] = x_ref[...].astype(jnp.float32)

    # bf16 MXU matmul, f32 accumulation; bias-add / ReLU stay f32 on the VPU.
    h = jnp.dot(act_ref[...].astype(compute_dtype), w_ref[0],
                preferred_element_type=jnp.float32)
    h = h + b_ref[0]  # (1, P) broadcast over rows

    @pl.when(l < num_layers - 1)
    def _():
        act_ref[...] = jnp.maximum(h, 0.0)

    @pl.when(l == num_layers - 1)
    def _():
        o_ref[...] = h.astype(o_ref.dtype)


def mlp_pallas(x, w_stack, b_stack, out_dim, *, block_batch: int = 256):
    """x: [B, Din]; w_stack: [L, P, P] (bf16); b_stack: [L, 1, P] (f32) -> [B, out_dim]."""
    num_layers, P, _ = w_stack.shape
    B, Din = x.shape
    out_dtype = x.dtype
    compute_dtype = w_stack.dtype

    # Dtype-aware row tile: bf16 tiles need a sublane multiple of 16 (f32 needs 8).
    sublane = 16 if jnp.dtype(compute_dtype).itemsize == 2 else 8
    tm = min(_round_up(B, sublane), block_batch)
    B_pad = _round_up(B, tm)
    # NOTE: on v7x (2 TCs) the "parallel" batch axis only shards across cores when
    # B_pad // tm >= 2; at tiny batches (like this demo) the grid is (1, L).

    x_pad = jnp.zeros((B_pad, P), compute_dtype).at[:B, :Din].set(
        x.astype(compute_dtype))

    grid = (B_pad // tm, num_layers)  # layer (reduction-like) axis last

    flops = 2 * B_pad * P * P * num_layers
    bytes_accessed = int(
        x_pad.size * x_pad.dtype.itemsize
        + w_stack.size * w_stack.dtype.itemsize
        + b_stack.size * b_stack.dtype.itemsize
        + B_pad * P * jnp.dtype(out_dtype).itemsize
    )

    # Explicit VMEM budget: 2x streamed weight tile (double-buffered) + bias +
    # in/out tiles + activation scratch, with margin. Sized so realistic hidden
    # widths still fit under v7x's 64 MiB physical VMEM (bf16 weights help here).
    w_bytes = P * P * jnp.dtype(compute_dtype).itemsize
    need = (2 * w_bytes
            + 2 * P * 4
            + 2 * tm * P * jnp.dtype(compute_dtype).itemsize
            + 2 * tm * P * jnp.dtype(out_dtype).itemsize
            + tm * P * 4)
    vmem_limit = int(min(max(2 * need, 16 << 20), 128 << 20))

    kernel = functools.partial(_mlp_layer_kernel, num_layers=num_layers,
                               compute_dtype=compute_dtype)

    out = pl.pallas_call(
        kernel,
        out_shape=jax.ShapeDtypeStruct((B_pad, P), out_dtype),
        grid_spec=pltpu.PrefetchScalarGridSpec(
            num_scalar_prefetch=0,
            grid=grid,
            in_specs=[
                pl.BlockSpec((tm, P), lambda i, l: (i, 0)),        # x tile (const over l)
                pl.BlockSpec((1, P, P), lambda i, l: (l, 0, 0)),   # streamed weights
                pl.BlockSpec((1, 1, P), lambda i, l: (l, 0, 0)),   # streamed bias
            ],
            out_specs=pl.BlockSpec((tm, P), lambda i, l: (i, 0)),
            scratch_shapes=[pltpu.VMEM((tm, P), jnp.float32)],     # activation carry
        ),
        compiler_params=pltpu.CompilerParams(
            dimension_semantics=("parallel", "arbitrary"),
            vmem_limit_bytes=vmem_limit,
        ),
        cost_estimate=pl.CostEstimate(
            flops=flops, transcendentals=0, bytes_accessed=bytes_accessed),
    )(x_pad, w_stack, b_stack)

    return out[:B, :out_dim]


class MLPPallas:
    """Mirror of the PyTorch MLP: num_layers Linear layers, ReLU on all but the last."""

    def __init__(self, input_dim, hidden_dim, output_dim, num_layers, key,
                 param_dtype=jnp.float32, compute_dtype=jnp.bfloat16):
        self.num_layers = num_layers
        self.output_dim = output_dim
        dims_in = [input_dim] + [hidden_dim] * (num_layers - 1)
        dims_out = [hidden_dim] * (num_layers - 1) + [output_dim]

        self.params = []
        for n, k in zip(dims_in, dims_out):
            key, wk, bk = jax.random.split(key, 3)
            # Uniform in +-1/sqrt(fan_in), like PyTorch's default init range.
            bound = 1.0 / jnp.sqrt(jnp.asarray(n, param_dtype))
            w = jax.random.uniform(wk, (n, k), param_dtype, -bound, bound)  # [in, out]
            b = jax.random.uniform(bk, (k,), param_dtype, -bound, bound)
            self.params.append((w, b))

        # Pre-pad / pre-stack ONCE at init (not on every forward).
        # All feature dims padded to one lane-dense width P (multiple of 128); zeros in
        # padded rows/cols keep padded lanes exactly 0 through matmul/bias/ReLU.
        # (Per-layer padded dims would save MXU passes when dims differ a lot; square P
        #  is kept here for the simple streamed-weight layout.)
        P = _round_up(max([input_dim] + dims_out), 128)
        self.P = P
        w_stack = jnp.zeros((num_layers, P, P), param_dtype)
        b_stack = jnp.zeros((num_layers, 1, P), param_dtype)
        for i, (w, b) in enumerate(self.params):
            n, k = w.shape
            w_stack = w_stack.at[i, :n, :k].set(w)
            b_stack = b_stack.at[i, 0, :k].set(b)
        self.w_stack = w_stack.astype(compute_dtype)   # bf16: MXU rate + half HBM/VMEM
        self.b_stack = b_stack                          # bias stays f32

    def __call__(self, x):
        return mlp_pallas(x, self.w_stack, self.b_stack, self.output_dim)


def mlp_reference(x, params, num_layers, cast_dtype=None):
    """Pure-JAX reference. If cast_dtype is set, mimics the kernel's bf16 MXU inputs."""
    h = x
    for i, (w, b) in enumerate(params):
        if cast_dtype is not None:
            h_in = h.astype(cast_dtype)
            w_in = w.astype(cast_dtype)
        else:
            h_in, w_in = h, w
        h = jnp.dot(h_in, w_in, preferred_element_type=jnp.float32) + b
        if i < num_layers - 1:
            h = jnp.maximum(h, 0.0)
    return h


if __name__ == "__main__":
    key = jax.random.PRNGKey(0)
    key, xkey, pkey = jax.random.split(key, 3)

    batch = 8
    input_dim = 16
    hidden_dim = 32
    output_dim = 8
    num_layers = 3

    x = jax.random.normal(xkey, (batch, input_dim), jnp.float32)

    mlp = MLPPallas(input_dim, hidden_dim, output_dim, num_layers, pkey)

    out = jax.block_until_ready(mlp(x))
    assert out.shape == (batch, output_dim), out.shape

    ref_bf16 = mlp_reference(x, mlp.params, num_layers, cast_dtype=jnp.bfloat16)
    ref_f32 = mlp_reference(x, mlp.params, num_layers)
    assert jnp.allclose(out, ref_bf16, atol=2e-3, rtol=2e-3), "mismatch vs bf16 reference"
    assert jnp.allclose(out, ref_f32, atol=5e-2, rtol=5e-2), "mismatch vs f32 reference"

    print("KERNEL_OK")
</pallas_src>

<mosaic_0001>
module attributes {stable_mosaic.version = 11 : i64} {
  func.func @_mlp_layer_kernel(%arg0: i32, %arg1: i32, %arg2: memref<16x128xbf16, #tpu.memory_space<vmem>>, %arg3: memref<1x128x128xbf16, #tpu.memory_space<vmem>>, %arg4: memref<1x1x128xf32, #tpu.memory_space<vmem>>, %arg5: memref<16x128xf32, #tpu.memory_space<vmem>>, %arg6: memref<16x128xf32, #tpu.memory_space<vmem>>) attributes {dimension_semantics = [#tpu.dimension_semantics<parallel>, #tpu.dimension_semantics<arbitrary>], iteration_bounds = array<i64: 1, 3>, scalar_prefetch = 0 : i64, scratch_operands = 1 : i64, tpu.core_type = #tpu.core_type<tc>, window_params = [{transform_indices = @transform_0, window_bounds = array<i64: 16, 128>}, {transform_indices = @transform_1, window_bounds = array<i64: 1, 128, 128>}, {transform_indices = @transform_2, window_bounds = array<i64: 1, 1, 128>}, {transform_indices = @transform_3, window_bounds = array<i64: 16, 128>}]} {
    %c0_i32 = arith.constant 0 : i32
    %0 = arith.cmpi eq, %arg1, %c0_i32 : i32
    %1 = arith.extui %0 : i1 to i32
    %c0_i32_0 = arith.constant 0 : i32
    %2 = arith.cmpi ne, %1, %c0_i32_0 : i32
    scf.if %2 {
      %c0_11 = arith.constant 0 : index
      %c0_12 = arith.constant 0 : index
      %18 = vector.load %arg2[%c0_11, %c0_12] : memref<16x128xbf16, #tpu.memory_space<vmem>>, vector<16x128xbf16>
      %19 = arith.extf %18 : vector<16x128xbf16> to vector<16x128xf32>
      %c0_13 = arith.constant 0 : index
      %c0_14 = arith.constant 0 : index
      %20 = vector.load %arg6[%c0_13, %c0_14] : memref<16x128xf32, #tpu.memory_space<vmem>>, vector<16x128xf32>
      tpu.vector_store %arg6[%c0_13, %c0_14], %19 {strides = array<i32>} : memref<16x128xf32, #tpu.memory_space<vmem>>, vector<16x128xf32>,
    } else {
    }
    %c0 = arith.constant 0 : index
    %c0_1 = arith.constant 0 : index
    %3 = vector.load %arg6[%c0, %c0_1] : memref<16x128xf32, #tpu.memory_space<vmem>>, vector<16x128xf32>
    %4 = arith.truncf %3 : vector<16x128xf32> to vector<16x128xbf16>
    %c0_2 = arith.constant 0 : index
    %c0_3 = arith.constant 0 : index
    %c0_4 = arith.constant 0 : index
    %5 = vector.load %arg3[%c0_2, %c0_3, %c0_4] : memref<1x128x128xbf16, #tpu.memory_space<vmem>>, vector<1x128x128xbf16>
    %6 = vector.shape_cast %5 : vector<1x128x128xbf16> to vector<128x128xbf16>
    %cst = arith.constant dense<0.000000e+00> : vector<16x128xf32>
    %7 = tpu.matmul %4, %6, %cst {dimension_numbers = #tpu.dot_dimension_numbers<[1], [0], [0], [1], [0, 0, 1, 1], [], []>} : vector<16x128xbf16>, vector<128x128xbf16>, vector<16x128xf32> -> vector<16x128xf32>
    %c0_5 = arith.constant 0 : index
    %c0_6 = arith.constant 0 : index
    %c0_7 = arith.constant 0 : index
    %8 = vector.load %arg4[%c0_5, %c0_6, %c0_7] : memref<1x1x128xf32, #tpu.memory_space<vmem>>, vector<1x1x128xf32>
    %9 = vector.shape_cast %8 : vector<1x1x128xf32> to vector<1x128xf32>
    %10 = vector.broadcast %9 : vector<1x128xf32> to vector<16x128xf32>
    %11 = arith.addf %7, %10 : vector<16x128xf32>
    %c2_i32 = arith.constant 2 : i32
    %12 = arith.cmpi slt, %arg1, %c2_i32 : i32
    %13 = arith.extui %12 : i1 to i32
    %c0_i32_8 = arith.constant 0 : i32
    %14 = arith.cmpi ne, %13, %c0_i32_8 : i32
    scf.if %14 {
      %cst_11 = arith.constant 0.000000e+00 : f32
      %18 = vector.broadcast %cst_11 : f32 to vector<16x128xf32>
      %19 = arith.maximumf %11, %18 : vector<16x128xf32>
      %c0_12 = arith.constant 0 : index
      %c0_13 = arith.constant 0 : index
      %20 = vector.load %arg6[%c0_12, %c0_13] : memref<16x128xf32, #tpu.memory_space<vmem>>, vector<16x128xf32>
      tpu.vector_store %arg6[%c0_12, %c0_13], %19 {strides = array<i32>} : memref<16x128xf32, #tpu.memory_space<vmem>>, vector<16x128xf32>,
    } else {
    }
    %c2_i32_9 = arith.constant 2 : i32
    %15 = arith.cmpi eq, %arg1, %c2_i32_9 : i32
    %16 = arith.extui %15 : i1 to i32
    %c0_i32_10 = arith.constant 0 : i32
    %17 = arith.cmpi ne, %16, %c0_i32_10 : i32
    scf.if %17 {
      %c0_11 = arith.constant 0 : index
      %c0_12 = arith.constant 0 : index
      %18 = vector.load %arg5[%c0_11, %c0_12] : memref<16x128xf32, #tpu.memory_space<vmem>>, vector<16x128xf32>
      tpu.vector_store %arg5[%c0_11, %c0_12], %11 {strides = array<i32>} : memref<16x128xf32, #tpu.memory_space<vmem>>, vector<16x128xf32>,
    } else {
    }
    return
  }
  func.func @transform_0(%arg0: i32, %arg1: i32) -> (i32, i32) {
    %c0_i32 = arith.constant 0 : i32
    %c0_i32_0 = arith.constant 0 : i32
    return %arg0, %c0_i32 : i32, i32
  }
  func.func @transform_1(%arg0: i32, %arg1: i32) -> (i32, i32, i32) {
    %c0_i32 = arith.constant 0 : i32
    %c0_i32_0 = arith.constant 0 : i32
    %c0_i32_1 = arith.constant 0 : i32
    return %arg1, %c0_i32, %c0_i32_0 : i32, i32, i32
  }
  func.func @transform_2(%arg0: i32, %arg1: i32) -> (i32, i32, i32) {
    %c0_i32 = arith.constant 0 : i32
    %c0_i32_0 = arith.constant 0 : i32
    %c0_i32_1 = arith.constant 0 : i32
    return %arg1, %c0_i32, %c0_i32_0 : i32, i32, i32
  }
  func.func @transform_3(%arg0: i32, %arg1: i32) -> (i32, i32) {
    %c0_i32 = arith.constant 0 : i32
    %c0_i32_0 = arith.constant 0 : i32
    return %arg0, %c0_i32 : i32, i32
  }
}

</mosaic_0001>

<bundles_post_ra>
// kernel: tpu_custom_call.1
= control target key start
LH: loop header
LB: loop body
LE: loop exit
PB: predicated region body
PF: predicated region fallthrough
CT: control target
= control target key end

     0   :  { %8 = vsyncpa [#allocation4], 0  ;;  %s950_s0 = inlined_call_operand.hbm [shape: bf16[16,128], index: 0, kind: input, shape index: {}]   ;;  %s951_s1 = inlined_call_operand.hbm [shape: bf16[3,128,128], index: 1, kind: input, shape index: {}]   ;;  %s952_s2 = inlined_call_operand.vmem [shape: f32[3,1,128], index: 2, kind: input, shape index: {}]   ;;  %s953_s3 = inlined_call_operand.hbm [shape: f32[16,128], index: 3, kind: output, shape index: {}]  }
   0x1   :  { %9 = vsyncpa [#allocation7], 0 }
   0x2   :  { %11 = vsyncpa [#allocation7 + $0x1], 0 }
   0x3   :  { %12 = vsyncpa [#allocation5], 0  ;;  %s783_s12 = smov 0   ;;  %s785_s13 = smov 0  }
   0x4   :  { %s787_s14 = smov 0   ;;  %s789_s15 = smov 0  }
   0x5   :  { %s791_s16 = smov 0   ;;  %s793_s17 = smov 0  }
   0x6 LB: > { %s469_s18 = sadd.s32 4294967295, %s752_s17   ;;  %p76_p0 = scmp.ne.s32.totalorder %s736_s13, %s732_s12  ;;  %s752_s17 = sphi %s793_s17, %s18_s17   ;;  %s748_s16 = sphi %s791_s16, %s964_s16   ;;  %s744_s15 = sphi %s789_s15, %s963_s15   ;;  %s740_s14 = sphi %s787_s14, %s962_s14   ;;  %s736_s13 = sphi %s785_s13, %s961_s13   ;;  %s732_s12 = sphi %s783_s12, %s960_s12  }
   0x7   : > { %p815_p1 = scmp.eq.s32.totalorder %s469_s18, 0  ;;  %p470_p2 = scmp.ge.s32.totalorder %s752_s17, 1 }
   0x8   : > { %p139_p3 = scmp.lt.s32.totalorder %s752_s17, 4  ;;  %s754_s22 = smov [#allocation3]  }
   0x9   : > { %p823_p4 = por %p815_p1, %p76_p0  ;;  %s154_s23 = sshll.u32 %s754_s22, 4  ;;  %s155_s23 = int_to_ptr.vmem [resolvable:$true] %s154_s23 }
   0xa   : > { %p827_p5 = pnand %p470_p2, %p139_p3  ;;  %s27_s25 = sadd.s32 1, %s748_s16 }
   0xb   : > { %s627_s26 = scalar_lea.vmem %s155_s23, 128  ;;  %p635_p12 = scmp.lt.s32.totalorder %s155_s23, %s155_s23 }
   0xc   : > { %p539_p6 = pneg %p827_p5  ;;  %p628_p9 = scmp.ne.s32.totalorder %s155_s23, %s627_s26 }
   0xd   : > { %p636_p13 = scmp.lt.s32.totalorder %s627_s26, %s627_s26 }
   0xe   : > { %p835_p7 = pnand %p539_p6, %p815_p1 }
   0xf   : > { %p637_p0 = por %p636_p13, %p635_p12 }
  0x10   : > { %p618_p8 = pneg %p835_p7 }
  0x12   : > { %p630_p10 = pnand %p628_p9, %p618_p8 }
  0x14   : > { %p631_p11 = pneg %p630_p10 }
  0x16   : > { %p638_p2 = pnand %p637_p0, %p631_p11 }
  0x18   : > { %641 = shalt.err (!%p638_p2)
}
  0x19   : > { %s755_s27 = smov 64   ;;  %s756_s28 = smov 4  }
  0x1a   : > { %542 = dma.hbm_to_vmem [thread:$0]  (!%p835_p7), %s950_s0, 128, %s155_s23, [#allocation4], %s755_s27, %s755_s27, %s756_s28  }
  0x1b   : > { %p28_p3 = scmp.ge.s32.totalorder %s27_s25, 3  ;;  %s63_s4 = sadd.s32 1, %s740_s14 }
  0x1c   : > { %p70_p6 = scmp.ne.s32.totalorder %s740_s14, %s736_s13  ;;  %p71_p8 = scmp.eq.s32.totalorder %s752_s17, 0 }
  0x1d   : > { %s966_s25 = smov (%p28_p3, %s27_s25), 0  ;;  %p548_p10 = scmp.lt.s32.totalorder %s752_s17, 3 }
  0x1e   : > { %p72_p9 = por %p71_p8, %p70_p6  ;;  %s60_s5 = ssub.s32 %s748_s16, %s966_s25 }
  0x1f   : > { %s168_s6 = sand.u32 1, %s740_s14   ;;  %p61_p11 = scmp.eq.s32.totalorder %s60_s5, 0 }
  0x20   : > { %s473_s7 = sshll.u32 %s168_s6, 6  ;;  %s495_s8 = sshll.u32 %s748_s16, 10 }
  0x21   : > { %s862_s9 = scalar_select %p61_p11, %s740_s14, %s63_s4  }
  0x22   : > { %s178_s12 = scalar_lea.hbm %s951_s1, %s495_s8  ;;  %s172_s22 = scalar_lea.vmem [#allocation6], %s473_s7 }
  0x23   : > { %s179_s23 = sshll.u32 %s172_s22, 4  ;;  %p867_p7 = pnand %p548_p10, %p72_p9  ;;  %s180_s23 = int_to_ptr.vmem [resolvable:$true] %s179_s23 }
  0x24   : > { %s169_s26 = scalar_lea.sflag [#allocation7], %s168_s6  ;;  %s655_s29 = scalar_lea.vmem %s180_s23, 1024 }
  0x25   : > { %p644_p12 = pneg %p867_p7  ;;  %p656_p13 = scmp.ne.s32.totalorder %s180_s23, %s655_s29 }
  0x26   : > { %s757_s30 = smov [#allocation6]  }
  0x27   : > { %p658_p0 = pnand %p656_p13, %p644_p12  ;;  %s660_s4 = sshll.u32 %s757_s30, 4  ;;  %s661_s4 = int_to_ptr.vmem [resolvable:$false] %s660_s4 }
  0x28   : > { %s662_s5 = scalar_lea.vmem %s661_s4, 2048  ;;  %p663_p3 = scmp.lt.s32.totalorder %s180_s23, %s661_s4 }
  0x29   : > { %p659_p2 = pneg %p658_p0  ;;  %p664_p6 = scmp.lt.s32.totalorder %s662_s5, %s655_s29 }
  0x2b   : > { %p665_p8 = por %p664_p6, %p663_p3 }
  0x2d   : > { %p666_p9 = pnand %p665_p8, %p659_p2 }
  0x2f   : > { %669 = shalt.err (!%p666_p9)
}
  0x30   : > { %546 = dma.hbm_to_vmem [thread:$0]  (!%p867_p7), %s178_s12, 1024, %s180_s23, %s169_s26, %s755_s27, %s755_s27, %s756_s28  }
  0x31   : > { %197 = sbr.rel (%p827_p5) target bundleno = 330 (0x14a), region = 32 }
  0x36   : > { %719 = dma.done.wait (%p815_p1), [#allocation4], 128  }
  0x37   : > { %721 = vsyncadd (%p815_p1), [#allocation4], 4294967168  ;;  %s203_s6 = sand.u32 1, %s736_s13  }
  0x38   : > { %s478_s7 = sshll.u32 %s203_s6, 6  ;;  %s204_s8 = scalar_lea.sflag [#allocation7], %s203_s6 }
  0x39   : > { %s885_s10 = scalar_lea.vmem [#allocation6], %s478_s7 }
  0x3a   : > { %723 = dma.done.wait (%p823_p4), %s204_s8, 1024  }
  0x3b   : > { %725 = vsyncadd (%p823_p4), %s204_s8, 4294966272  ;;  %p229_p5 = scmp.lt.s32.totalorder %s744_s15, 2  ;;  %p479_p1 = scmp.ne.s32.totalorder %s744_s15, 0 }
  0x3d   : > { %s893_s21 = scalar_select %p229_p5, %s744_s15, 2 }
  0x3e   : > { %237 = sbr.rel (%p479_p1) target bundleno = 71 (0x47), region = 44 }
  0x3f   : > { %s231_s28 = scalar_lea.vmem %s952_s2, %s893_s21 }
  0x43   : > { %v497_v0 = vld [vmem:[#allocation3] sm:$0xff]  }
  0x44   : > { %v498_v1 = vunpack.c.l.bf16 %v497_v0  ;;  %v499_v2 = vunpack.c.h.bf16 %v497_v0 }
  0x46   : > { %242 = vst [vmem:[#allocation2] sm:$0xff] %v498_v1  ;;  %243 = vst [vmem:[#allocation2 + $0x8] sm:$0xff] %v499_v2 }
  0x47 PF: > { %v608_v3 = vld [vmem:[%s885_s10 + $0x38] sm:$0xff]   ;;  %v758_v4 = vmov 0.0   ;;  %v609_v5 = vld [vmem:[%s885_s10 + $0x30] sm:$0xff]   ;;  %vm759_vm0 = vmmov 0   ;;  %v610_v6 = vld [vmem:[%s885_s10 + $0x28] sm:$0xff]   ;;  %p489_p4 = scmp.ge.s32.totalorder %s744_s15, 2 }
  0x48   : > { %509 = vmatprep.subr.bf16.mxu0 %v758_v4  ;;  %525 = vmatprep.mubr.msk.bf16.mxu0 %vm759_vm0, %v758_v4  ;;  %v611_v7 = vld [vmem:[%s885_s10 + $0x20] sm:$0xff]   ;;  %v612_v8 = vld [vmem:[%s885_s10 + $0x18] sm:$0xff]   ;;  %v613_v9 = vld [vmem:[%s885_s10 + $0x10] sm:$0xff]  }
  0x49   : > { %510 = vmatpush3.bf16.msra.mxu0 %v608_v3  ;;  %v614_v10 = vld [vmem:[%s885_s10 + $0x8] sm:$0xff]   ;;  %v615_v11 = vld [vmem:[%s885_s10] sm:$0xff]  }
  0x4a   : > { %511 = vmatprep.subr.bf16.mxu0 %v758_v4  ;;  %v480_v15 = vld [vmem:[%s231_s28] ss:$0 sm:$0xff] }
  0x4d   : > { %512 = vmatpush3.bf16.msra.mxu0 %v609_v5  ;;  %v244_v12 = vld [vmem:[#allocation2] sm:$0xff]  ;;  %v245_v13 = vld [vmem:[#allocation2 + $0x8] sm:$0xff] }
  0x4e   : > { %513 = vmatprep.subr.bf16.mxu0 %v758_v4  ;;  %v246_v14 = vpack.c.bf16 %v245_v13, %v244_v12 }
  0x51   : > { %514 = vmatpush3.bf16.msra.mxu0 %v610_v6 }
  0x52   : > { %515 = vmatprep.subr.bf16.mxu0 %v758_v4 }
  0x55   : > { %516 = vmatpush3.bf16.msra.mxu0 %v611_v7 }
  0x56   : > { %517 = vmatprep.subr.bf16.mxu0 %v758_v4 }
  0x59   : > { %518 = vmatpush3.bf16.msra.mxu0 %v612_v8 }
  0x5a   : > { %519 = vmatprep.subr.bf16.mxu0 %v758_v4 }
  0x5d   : > { %520 = vmatpush3.bf16.msra.mxu0 %v613_v9 }
  0x5e   : > { %521 = vmatprep.subr.bf16.mxu0 %v758_v4 }
  0x61   : > { %522 = vmatpush3.bf16.msra.mxu0 %v614_v10 }
  0x62   : > { %523 = vmatprep.subr.bf16.mxu0 %v758_v4 }
  0x65   : > { %524 = vmatpush3.bf16.msra.mxu0 %v615_v11 }
  0x68   : > { %526 = vmatmul.mubr.bf16.vlgmr.msra.gmra.mxu0 %v246_v14 }
 0x128   : > { %v352_v16 = vpop.f32.mrf.mxu0 }
 0x129   : > { %v353_v17 = vadd.f32 %v480_v15, %v352_v16 }
 0x12a   : > { %v527_v18 = vpop.f32.mrf.mxu0  ;;  %362 = sbr.rel (%p489_p4) target bundleno = 306 (0x132), region = 48 }
 0x12c   : > { %v355_v19 = vpop.f32.mrf.mxu0 }
 0x12d   : > { %v356_v20 = vadd.f32 %v480_v15, %v355_v19 }
 0x12e   : > { %v528_v21 = vpop.f32.mrf.mxu0 }
 0x12f   : > { %v363_v22 = vmax.f32 %v353_v17, 0.0  ;;  %v364_v23 = vmax.f32 %v356_v20, 0.0 }
 0x131   : > { %365 = vst [vmem:[#allocation2] sm:$0xff] %v363_v22  ;;  %366 = vst [vmem:[#allocation2 + $0x8] sm:$0xff] %v364_v23 }
 0x132 PF: > { %p490_p10 = scmp.ne.s32.totalorder %s744_s15, 2 }
 0x134   : > { %370 = sbr.rel (%p490_p10) target bundleno = 314 (0x13a), region = 52 }
 0x139   : > { %371 = vst [vmem:[#allocation8] sm:$0xff] %v353_v17  ;;  %372 = vst [vmem:[#allocation8 + $0x8] sm:$0xff] %v356_v20 }
 0x13a PF: > { %p917_p11 = scmp.eq.s32.totalorder %s469_s18, 2  ;;  %s760_s22 = smov [#allocation8]  }
 0x13b   : > { %s382_s23 = sshll.u32 %s760_s22, 4  ;;  %s383_s23 = int_to_ptr.vmem [resolvable:$true] %s382_s23 }
 0x13c   : > { %s670_s24 = scalar_lea.vmem %s383_s23, 256  ;;  %p677_p0 = scmp.lt.s32.totalorder %s383_s23, %s383_s23 }
 0x13d   : > { %p671_p7 = scmp.ne.s32.totalorder %s383_s23, %s670_s24  ;;  %p678_p2 = scmp.lt.s32.totalorder %s670_s24, %s670_s24 }
 0x13f   : > { %p672_p12 = pnand %p671_p7, %p917_p11  ;;  %p679_p3 = por %p678_p2, %p677_p0 }
 0x141   : > { %p673_p13 = pneg %p672_p12 }
 0x143   : > { %p680_p6 = pnand %p679_p3, %p673_p13 }
 0x145   : > { %683 = shalt.err (!%p680_p6)
}
 0x146   : > { %s761_s15 = smov 128   ;;  %s762_s18 = smov 8  }
 0x147   : > { %536 = dma.vmem_to_hbm [thread:$0]  (%p917_p11), %s383_s23, 256, %s953_s3, [#allocation5], %s761_s15, %s761_s15, %s762_s18  }
 0x148   : > { %727 = dma.done.wait (%p917_p11), [#allocation5], 256  }
 0x149   : > { %729 = vsyncadd (%p917_p11), [#allocation5], 4294967040 }
 0x14a PF: > { %s18_s17 = sadd.s32 1, %s752_s17   ;;  %s960_s12 = smov %s736_s13 }
 0x14b   : > { %p15_p8 = scmp.ge.s32.totalorder %s18_s17, 5   ;;  %s961_s13 = smov %s740_s14 }
 0x14c   : > { %s962_s14 = smov %s862_s9  ;;  %s963_s15 = smov %s748_s16 }
 0x14d   : > { %s964_s16 = smov %s966_s25  ;;  %17 = sbr.rel (!%p15_p8) target bundleno = 6 (0x6), region = 91 }
 0x152   :  { %398 = vsyncpa [#allocation4], 1 }
 0x153   :  { %400 = vsyncpa [#allocation4 + $0x1], 1 }
 0x154   :  { %401 = vsyncpa [#allocation7], 1 }
 0x155   :  { %403 = vsyncpa [#allocation7 + $0x1], 1 }
 0x156   :  { %404 = vsyncpa [#allocation5], 1 }
 0x157   :  { %406 = vsyncpa [#allocation5 + $0x1], 1 }

</bundles_post_ra>
